<compile_context>
chip_gen: v5e
topology: v5e:2x2
jax: 0.10.0
libtpu: 0.0.40
codegen_flags: <defaults>
</compile_context>

<pallas_src>
import jax
import jax.numpy as jnp
from jax.experimental import pallas as pl
from jax.experimental.pallas import tpu as pltpu

_MIB = 1024 * 1024


def cross_network_kernel(x_ref, m_ref, b_ref, o_ref):
    """One row-tile of the cross network.

    x_ref: (TS, W)    packed rows; W = G*E lanes (G original rows per lane-row)
    m_ref: (L, W, W)  per-layer block-diagonal kron(I_G, w_i * ones(1, E)) matrices
    b_ref: (L, W)     per-layer bias, tiled G times along lanes
    o_ref: (TS, W)
    """
    x0 = x_ref[...].astype(jnp.float32)
    # Hoisted parameter loads (already f32 from the wrapper): no per-layer masked
    # loads / casts inside the loop.
    m_all = m_ref[...]                       # (L, W, W)
    b_all = b_ref[...]                       # (L, W)
    x = x0
    num_layers = m_all.shape[0]
    for i in range(num_layers):              # static, small trip count
        # Segmented <x_row, w_i> reduce + broadcast over each 32-lane group in one
        # MXU matmul (block-diagonal weights => no cross-row mixing).
        xw = jnp.dot(x, m_all[i], preferred_element_type=jnp.float32)
        x = x0 * xw + b_all[i:i + 1, :] + x
    o_ref[...] = x.astype(o_ref.dtype)


def _vmem_plan():
    """Generation-aware scoped-VMEM limit and per-buffer tile budget (bytes)."""
    try:
        phys = int(pltpu.get_tpu_info().vmem_capacity_bytes)  # 64 MiB/TC on v7x, 128 MiB v5e/v6e
    except Exception:
        phys = 64 * _MIB                                      # be conservative if unknown
    scoped = min(48 * _MIB, (3 * phys) // 4)  # never past ~48 MiB (v7x-safe)
    # ~12 tile-sized f32 buffers are live: 2x double-buffered input, 2x output,
    # plus in-kernel x0 / x / xw temporaries.
    return scoped, max(_MIB // 2, scoped // 12)


def _pick_sublane_tile(rows, width, itemsize, per_buffer_bytes):
    """Row (sublane) tile: multiple of 8, VMEM-budgeted, >=4 grid steps if possible."""
    budget = max(8, (per_buffer_bytes // (width * itemsize)) // 8 * 8)
    quarter = ((-(-rows // 4)) + 7) // 8 * 8          # ~rows/4 -> keep v7x megacore busy
    ts = min(budget, max(256, quarter))
    return min(ts, rows)                              # == full dim for small inputs (legal)


@jax.jit
def cross_network(x, w, b):
    """x: (B, F, E); w: (L, E); b: (L, E).  Returns (B, F, E), dtype of x."""
    B, F, E = x.shape
    L = w.shape[0]
    R = B * F

    # Pack G rows per 128-lane row (contiguous reshape => zero HBM cost under jit).
    G = 128 // E if (E <= 128 and 128 % E == 0) else 1
    W = G * E

    xf = x.reshape(R, E)
    Rpk = -(-R // G)                                  # packed rows
    if Rpk * G != R:
        # Rare ragged case (R not a multiple of G): pad a few rows so the packed view
        # exists.  Costs one copy; common DCN shapes never hit it.
        xf = jnp.pad(xf, ((0, Rpk * G - R), (0, 0)))
    xp = xf.reshape(Rpk, W)
    if Rpk < 8:
        # Tiny inputs only: keep the single block sublane-aligned (few-KiB pad).
        xp = jnp.pad(xp, ((0, 8 - Rpk), (0, 0)))
    Rp = xp.shape[0]

    # Per-layer block-diagonal "reduce + broadcast" matrices kron(I_G, w_i * 1^T)
    # and lane-tiled biases.  Tiny (L*W*W*4 bytes); built once in f32 (hoisted cast).
    w32 = w.astype(jnp.float32)                                   # (L, E)
    blk = w32[:, :, None] * jnp.ones((1, 1, E), jnp.float32)      # (L, E, E)
    eye_g = jnp.eye(G, dtype=jnp.float32)
    m = jnp.einsum("ab,lcd->lacbd", eye_g, blk).reshape(L, W, W)  # (L, W, W)
    bt = jnp.tile(b.astype(jnp.float32), (1, G))                  # (L, W)

    scoped_vmem, per_buf = _vmem_plan()
    itemsize = jnp.dtype(x.dtype).itemsize
    TS = _pick_sublane_tile(Rp, W, max(itemsize, 4), per_buf)
    n_tiles = pl.cdiv(Rp, TS)

    cost = pl.CostEstimate(
        flops=int(n_tiles * TS * W * (2 * W + 3) * L),
        transcendentals=0,
        bytes_accessed=int(2 * Rp * W * itemsize + m.size * 4 + bt.size * 4),
    )

    out = pl.pallas_call(
        cross_network_kernel,
        out_shape=jax.ShapeDtypeStruct((Rp, W), x.dtype),
        grid=(n_tiles,),
        in_specs=[
            pl.BlockSpec((TS, W), lambda i: (i, 0)),        # row tiles, auto-pipelined
            pl.BlockSpec((L, W, W), lambda i: (0, 0, 0)),   # weights stay VMEM-resident
            pl.BlockSpec((L, W), lambda i: (0, 0)),         # biases  stay VMEM-resident
        ],
        out_specs=pl.BlockSpec((TS, W), lambda i: (i, 0)),
        compiler_params=pltpu.CompilerParams(
            dimension_semantics=("parallel",),              # megacore sharding on v7x
            vmem_limit_bytes=int(scoped_vmem),
        ),
        cost_estimate=cost,
    )(xp, m, bt)

    out = out[:Rpk]                      # drop tiny-input alignment pad (no-op otherwise)
    y = out.reshape(Rpk * G, E)          # contiguous reshape back: zero HBM cost
    if Rpk * G != R:
        y = y[:R]
    return y.reshape(B, F, E)


def cross_network_ref(x, w, b):
    """Pure-JAX reference mirroring the PyTorch forward."""
    x0 = x
    out = x
    for i in range(w.shape[0]):
        xw = jnp.sum(out * w[i], axis=-1, keepdims=True)    # Linear(E, 1, bias=False)
        out = x0 * xw + b[i] + out
    return out


def _make_inputs(key, B, F, E, L, dtype=jnp.float32):
    kx, kw, kb = jax.random.split(key, 3)
    x = jax.random.normal(kx, (B, F, E), dtype=dtype)
    # Linear weight ~ U(-1/sqrt(E), 1/sqrt(E)); small nonzero bias to exercise the add.
    w = jax.random.uniform(kw, (L, E), dtype=dtype,
                           minval=-1.0 / float(E) ** 0.5,
                           maxval=1.0 / float(E) ** 0.5)
    b = 0.1 * jax.random.normal(kb, (L, E), dtype=dtype)
    return x, w, b


if __name__ == "__main__":
    # Small shapes implied by the module: (batch, num_fields, embed_dim), L layers.
    B, F, E, L = 2, 4, 32, 3
    x, w, b = _make_inputs(jax.random.PRNGKey(0), B, F, E, L)
    out = jax.block_until_ready(cross_network(x, w, b))
    ref = cross_network_ref(x, w, b)
    assert out.shape == (B, F, E)
    assert jnp.allclose(out, ref, atol=1e-4, rtol=1e-4), "mismatch vs reference (small)"

    # Second run exercises the multi-tile grid and a partial (masked) last block:
    # R = 2560 rows -> 640 packed rows -> 3 tiles of 256 (last one ragged, no pad).
    B2, F2, E2, L2 = 128, 20, 32, 3
    x2, w2, b2 = _make_inputs(jax.random.PRNGKey(1), B2, F2, E2, L2)
    out2 = jax.block_until_ready(cross_network(x2, w2, b2))
    ref2 = cross_network_ref(x2, w2, b2)
    assert jnp.allclose(out2, ref2, atol=1e-3, rtol=1e-3), "mismatch vs reference (tiled)"

    print("KERNEL_OK")
</pallas_src>

<mosaic_0001>
module attributes {stable_mosaic.version = 11 : i64} {
  func.func @cross_network_kernel(%arg0: i32, %arg1: memref<8x128xf32, #tpu.memory_space<vmem>>, %arg2: memref<3x128x128xf32, #tpu.memory_space<vmem>>, %arg3: memref<3x128xf32, #tpu.memory_space<vmem>>, %arg4: memref<8x128xf32, #tpu.memory_space<vmem>>) attributes {dimension_semantics = [#tpu.dimension_semantics<parallel>], iteration_bounds = array<i64: 1>, scalar_prefetch = 0 : i64, scratch_operands = 0 : i64, tpu.core_type = #tpu.core_type<tc>, window_params = [{transform_indices = @transform_0, window_bounds = array<i64: 8, 128>}, {pipeline_mode = #tpu.pipeline_mode<synchronous>, transform_indices = @transform_1, window_bounds = array<i64: 3, 128, 128>}, {pipeline_mode = #tpu.pipeline_mode<synchronous>, transform_indices = @transform_2, window_bounds = array<i64: 3, 128>}, {transform_indices = @transform_3, window_bounds = array<i64: 8, 128>}]} {
    %c0 = arith.constant 0 : index
    %c0_0 = arith.constant 0 : index
    %0 = vector.load %arg1[%c0, %c0_0] : memref<8x128xf32, #tpu.memory_space<vmem>>, vector<8x128xf32>
    %c0_1 = arith.constant 0 : index
    %c0_2 = arith.constant 0 : index
    %c0_3 = arith.constant 0 : index
    %1 = vector.load %arg2[%c0_1, %c0_2, %c0_3] : memref<3x128x128xf32, #tpu.memory_space<vmem>>, vector<3x128x128xf32>
    %c0_4 = arith.constant 0 : index
    %c0_5 = arith.constant 0 : index
    %2 = vector.load %arg3[%c0_4, %c0_5] : memref<3x128xf32, #tpu.memory_space<vmem>>, vector<3x128xf32>
    %3 = vector.extract_strided_slice %1 {offsets = [0, 0, 0], sizes = [1, 128, 128], strides = [1, 1, 1]} : vector<3x128x128xf32> to vector<1x128x128xf32>
    %4 = vector.shape_cast %3 : vector<1x128x128xf32> to vector<128x128xf32>
    %cst = arith.constant dense<0.000000e+00> : vector<8x128xf32>
    %5 = tpu.matmul %0, %4, %cst {dimension_numbers = #tpu.dot_dimension_numbers<[1], [0], [0], [1], [0, 0, 1, 1], [], []>} : vector<8x128xf32>, vector<128x128xf32>, vector<8x128xf32> -> vector<8x128xf32>
    %6 = arith.mulf %0, %5 : vector<8x128xf32>
    %7 = vector.extract_strided_slice %2 {offsets = [0, 0], sizes = [1, 128], strides = [1, 1]} : vector<3x128xf32> to vector<1x128xf32>
    %8 = vector.broadcast %7 : vector<1x128xf32> to vector<8x128xf32>
    %9 = arith.addf %6, %8 : vector<8x128xf32>
    %10 = arith.addf %9, %0 : vector<8x128xf32>
    %11 = vector.extract_strided_slice %1 {offsets = [1, 0, 0], sizes = [1, 128, 128], strides = [1, 1, 1]} : vector<3x128x128xf32> to vector<1x128x128xf32>
    %12 = vector.shape_cast %11 : vector<1x128x128xf32> to vector<128x128xf32>
    %cst_6 = arith.constant dense<0.000000e+00> : vector<8x128xf32>
    %13 = tpu.matmul %10, %12, %cst_6 {dimension_numbers = #tpu.dot_dimension_numbers<[1], [0], [0], [1], [0, 0, 1, 1], [], []>} : vector<8x128xf32>, vector<128x128xf32>, vector<8x128xf32> -> vector<8x128xf32>
    %14 = arith.mulf %0, %13 : vector<8x128xf32>
    %15 = vector.extract_strided_slice %2 {offsets = [1, 0], sizes = [1, 128], strides = [1, 1]} : vector<3x128xf32> to vector<1x128xf32>
    %16 = vector.broadcast %15 : vector<1x128xf32> to vector<8x128xf32>
    %17 = arith.addf %14, %16 : vector<8x128xf32>
    %18 = arith.addf %17, %10 : vector<8x128xf32>
    %19 = vector.extract_strided_slice %1 {offsets = [2, 0, 0], sizes = [1, 128, 128], strides = [1, 1, 1]} : vector<3x128x128xf32> to vector<1x128x128xf32>
    %20 = vector.shape_cast %19 : vector<1x128x128xf32> to vector<128x128xf32>
    %cst_7 = arith.constant dense<0.000000e+00> : vector<8x128xf32>
    %21 = tpu.matmul %18, %20, %cst_7 {dimension_numbers = #tpu.dot_dimension_numbers<[1], [0], [0], [1], [0, 0, 1, 1], [], []>} : vector<8x128xf32>, vector<128x128xf32>, vector<8x128xf32> -> vector<8x128xf32>
    %22 = arith.mulf %0, %21 : vector<8x128xf32>
    %23 = vector.extract_strided_slice %2 {offsets = [2, 0], sizes = [1, 128], strides = [1, 1]} : vector<3x128xf32> to vector<1x128xf32>
    %24 = vector.broadcast %23 : vector<1x128xf32> to vector<8x128xf32>
    %25 = arith.addf %22, %24 : vector<8x128xf32>
    %26 = arith.addf %25, %18 : vector<8x128xf32>
    %c0_8 = arith.constant 0 : index
    %c0_9 = arith.constant 0 : index
    %27 = vector.load %arg4[%c0_8, %c0_9] : memref<8x128xf32, #tpu.memory_space<vmem>>, vector<8x128xf32>
    tpu.vector_store %arg4[%c0_8, %c0_9], %26 {strides = array<i32>} : memref<8x128xf32, #tpu.memory_space<vmem>>, vector<8x128xf32>,
    return
  }
  func.func @transform_0(%arg0: i32) -> (i32, i32) {
    %c0_i32 = arith.constant 0 : i32
    %c0_i32_0 = arith.constant 0 : i32
    return %arg0, %c0_i32 : i32, i32
  }
  func.func @transform_1(%arg0: i32) -> (i32, i32, i32) {
    %c0_i32 = arith.constant 0 : i32
    %c0_i32_0 = arith.constant 0 : i32
    %c0_i32_1 = arith.constant 0 : i32
    %c0_i32_2 = arith.constant 0 : i32
    return %c0_i32, %c0_i32_0, %c0_i32_1 : i32, i32, i32
  }
  func.func @transform_2(%arg0: i32) -> (i32, i32) {
    %c0_i32 = arith.constant 0 : i32
    %c0_i32_0 = arith.constant 0 : i32
    %c0_i32_1 = arith.constant 0 : i32
    return %c0_i32, %c0_i32_0 : i32, i32
  }
  func.func @transform_3(%arg0: i32) -> (i32, i32) {
    %c0_i32 = arith.constant 0 : i32
    %c0_i32_0 = arith.constant 0 : i32
    return %arg0, %c0_i32 : i32, i32
  }
}

</mosaic_0001>

<bundles_post_ra>
// kernel: tile.9
= control target key start
LH: loop header
LB: loop body
LE: loop exit
PB: predicated region body
PF: predicated region fallthrough
CT: control target
= control target key end

     0   :  { %s47_s12 = smov 32   ;;  %s48_s13 = smov 64   ;;  %vm15_vm0 = vcmask 261120   ;;  %vm21_vm1 = vcmask 1048320   ;;  %vm27_vm2 = vcmask 785920   ;;  %vm33_vm3 = vcmask 523520   ;;  %s71_s0 = inlined_call_operand.vmem [shape: f32[3,4,32], index: 0, kind: input, shape index: {}]   ;;  %s72_s1 = inlined_call_operand.vmem [shape: f32[3,128], index: 1, kind: output, shape index: {}]  }
   0x1   :  { %v41_v0 = vld [vmem:[%s71_s0 + $0x8] sm:$0xf]  ;;  %v42_v1 = vld [vmem:[%s71_s0 + $0x4] sm:$0xf]  ;;  %v12_v2 = vld [vmem:[%s71_s0] sm:$0xf] }
   0x2   :  { %7 = vst [vmem:[#allocation1 + $0x10] sm:$0xf] %v41_v0  ;;  %s46_s0 = smov 96  }
   0x3   :  { %11 = vst [vmem:[#allocation1 + $0x8] sm:$0xf] %v42_v1 }
   0x4   :  { %13 = vst [vmem:[#allocation1] sm:$0xf] %v12_v2 }
   0xb   :  { %v18_v3 = vld [vmem:[#allocation1 + $0x3] ss:$8 sm:$0x7]   ;;  %v30_v4 = vld [vmem:[#allocation1 + $0x1] ss:$8 sm:$0x7]  }
   0xc   :  { %19 = vrot.lane.b32.xlu0 %v18_v3, %s46_s0  ;;  %31 = vrot.lane.b32.xlu1 %v30_v4, %s47_s12  ;;  %v24_v5 = vld [vmem:[#allocation1 + $0x2] ss:$8 sm:$0x7]   ;;  %v14_v6 = vld [vmem:[#allocation1] ss:$8 sm:$0x7]  }
   0xd   :  { %16 = vst.msk [vmem:[#allocation0] sm:$0x7] %vm15_vm0, %v14_v6  }
  0x14   :  { %25 = vrot.lane.b32.xlu0 %v24_v5, %s48_s13 }
  0x7e   :  { %v20_v7 = vpop.permute.xlu0 %19   ;;  %v32_v8 = vpop.permute.xlu1 %31  }
  0x7f   :  { %22 = vst.msk [vmem:[#allocation0] sm:$0x7] %vm21_vm1, %v20_v7  }
  0x86   :  { %v26_v9 = vpop.permute.xlu0 %25  }
  0x87   :  { %28 = vst.msk [vmem:[#allocation0] sm:$0x7] %vm27_vm2, %v26_v9  }
  0x88   :  { %34 = vst.msk [vmem:[#allocation0] sm:$0x7] %vm33_vm3, %v32_v8  }
  0x8f   :  { %v37_v10 = vld [vmem:[#allocation0] sm:$0xf] }
  0x90   :  { %40 = vst [vmem:[%s72_s1] sm:$0xf] %v37_v10 }

// kernel: cross_network.1
= control target key start
LH: loop header
LB: loop body
LE: loop exit
PB: predicated region body
PF: predicated region fallthrough
CT: control target
= control target key end

     0   :  { %s314_s1 = inlined_call_operand.vmem [shape: f32[3,128,128], index: 1, kind: input, shape index: {}]   ;;  %s315_s0 = inlined_call_operand.vmem [shape: f32[8,128], index: 0, kind: input, shape index: {}]   ;;  %s316_s2 = inlined_call_operand.vmem [shape: f32[3,128], index: 2, kind: input, shape index: {}]   ;;  %s317_s3 = inlined_call_operand.vmem [shape: f32[8,128], index: 3, kind: output, shape index: {}]  }
   0x1   :  { %v30_v0 = vld [vmem:[%s314_s1 + $0x78] sm:$0xff]  ;;  %v29_v1 = vld [vmem:[%s314_s1 + $0x70] sm:$0xff]  ;;  %v28_v2 = vld [vmem:[%s314_s1 + $0x68] sm:$0xff] }
   0x2   :  { %64 = vmatpush.msra.mxu0 %v30_v0  ;;  %v27_v3 = vld [vmem:[%s314_s1 + $0x60] sm:$0xff]  ;;  %v46_v4 = vld [vmem:[%s314_s1 + $0xf8] sm:$0xff]  ;;  %v45_v6 = vld [vmem:[%s314_s1 + $0xf0] sm:$0xff] }
   0x3   :  { %v26_v5 = vld [vmem:[%s314_s1 + $0x58] sm:$0xff]  ;;  %88 = vmatpush.msra.mxu1 %v46_v4  ;;  %v44_v7 = vld [vmem:[%s314_s1 + $0xe8] sm:$0xff]  ;;  %v25_v8 = vld [vmem:[%s314_s1 + $0x50] sm:$0xff] }
   0x4   :  { %65 = vmatpush.msra.mxu0 %v29_v1  ;;  %v43_v9 = vld [vmem:[%s314_s1 + $0xe0] sm:$0xff]  ;;  %v24_v10 = vld [vmem:[%s314_s1 + $0x48] sm:$0xff]  ;;  %v42_v11 = vld [vmem:[%s314_s1 + $0xd8] sm:$0xff] }
   0x5   :  { %89 = vmatpush.msra.mxu1 %v45_v6  ;;  %v23_v12 = vld [vmem:[%s314_s1 + $0x40] sm:$0xff]  ;;  %v41_v13 = vld [vmem:[%s314_s1 + $0xd0] sm:$0xff]  ;;  %v22_v14 = vld [vmem:[%s314_s1 + $0x38] sm:$0xff] }
   0x6   :  { %66 = vmatpush.msra.mxu0 %v28_v2  ;;  %v40_v15 = vld [vmem:[%s314_s1 + $0xc8] sm:$0xff]  ;;  %v21_v16 = vld [vmem:[%s314_s1 + $0x30] sm:$0xff]  ;;  %v39_v17 = vld [vmem:[%s314_s1 + $0xc0] sm:$0xff] }
   0x7   :  { %90 = vmatpush.msra.mxu1 %v44_v7  ;;  %v20_v18 = vld [vmem:[%s314_s1 + $0x28] sm:$0xff]  ;;  %v38_v19 = vld [vmem:[%s314_s1 + $0xb8] sm:$0xff]  ;;  %v19_v20 = vld [vmem:[%s314_s1 + $0x20] sm:$0xff] }
   0x8   :  { %67 = vmatpush.msra.mxu0 %v27_v3  ;;  %v37_v21 = vld [vmem:[%s314_s1 + $0xb0] sm:$0xff]  ;;  %v18_v22 = vld [vmem:[%s314_s1 + $0x18] sm:$0xff]  ;;  %v36_v23 = vld [vmem:[%s314_s1 + $0xa8] sm:$0xff] }
   0x9   :  { %91 = vmatpush.msra.mxu1 %v43_v9  ;;  %v17_v24 = vld [vmem:[%s314_s1 + $0x10] sm:$0xff]  ;;  %v35_v25 = vld [vmem:[%s314_s1 + $0xa0] sm:$0xff]  ;;  %v16_v26 = vld [vmem:[%s314_s1 + $0x8] sm:$0xff] }
   0xa   :  { %68 = vmatpush.msra.mxu0 %v26_v5  ;;  %v15_v27 = vld [vmem:[%s314_s1] sm:$0xff]  ;;  %v34_v29 = vld [vmem:[%s314_s1 + $0x98] sm:$0xff]  ;;  %v33_v30 = vld [vmem:[%s314_s1 + $0x90] sm:$0xff] }
   0xb   :  { %92 = vmatpush.msra.mxu1 %v42_v11  ;;  %v14_v28 = vld [vmem:[%s315_s0] sm:$0xff]  ;;  %v32_v31 = vld [vmem:[%s314_s1 + $0x88] sm:$0xff]  ;;  %v62_v33 = vld [vmem:[%s314_s1 + $0x178] sm:$0xff] }
   0xc   :  { %69 = vmatpush.msra.mxu0 %v25_v8  ;;  %v31_v32 = vld [vmem:[%s314_s1 + $0x80] sm:$0xff]  ;;  %v61_v34 = vld [vmem:[%s314_s1 + $0x170] sm:$0xff]  ;;  %112 = vmatpush.msra.mxu2 %v62_v33  ;;  %v60_v35 = vld [vmem:[%s314_s1 + $0x168] sm:$0xff] }
   0xd   :  { %93 = vmatpush.msra.mxu1 %v41_v13  ;;  %v59_v36 = vld [vmem:[%s314_s1 + $0x160] sm:$0xff]  ;;  %v58_v37 = vld [vmem:[%s314_s1 + $0x158] sm:$0xff]  ;;  %v57_v38 = vld [vmem:[%s314_s1 + $0x150] sm:$0xff] }
   0xe   :  { %70 = vmatpush.msra.mxu0 %v24_v10  ;;  %113 = vmatpush.msra.mxu2 %v61_v34  ;;  %v56_v39 = vld [vmem:[%s314_s1 + $0x148] sm:$0xff]  ;;  %v55_v40 = vld [vmem:[%s314_s1 + $0x140] sm:$0xff]  ;;  %v54_v41 = vld [vmem:[%s314_s1 + $0x138] sm:$0xff] }
   0xf   :  { %94 = vmatpush.msra.mxu1 %v40_v15  ;;  %v53_v42 = vld [vmem:[%s314_s1 + $0x130] sm:$0xff]  ;;  %v52_v43 = vld [vmem:[%s314_s1 + $0x128] sm:$0xff]  ;;  %v51_v44 = vld [vmem:[%s314_s1 + $0x120] sm:$0xff] }
  0x10   :  { %71 = vmatpush.msra.mxu0 %v23_v12  ;;  %114 = vmatpush.msra.mxu2 %v60_v35  ;;  %v63_v45 = vld [vmem:[%s316_s2] sm:$0x7]  ;;  %v50_v51 = vld [vmem:[%s314_s1 + $0x118] sm:$0xff]  ;;  %v49_v52 = vld [vmem:[%s314_s1 + $0x110] sm:$0xff] }
  0x11   :  { %95 = vmatpush.msra.mxu1 %v39_v17  ;;  %v85_v46 = vperm.slane %v63_v45, 0  ;;  %v48_v53 = vld [vmem:[%s314_s1 + $0x108] sm:$0xff]  ;;  %v47_v54 = vld [vmem:[%s314_s1 + $0x100] sm:$0xff]  ;;  %v109_v55 = vperm.slane %v63_v45, 1  ;;  %v133_v60 = vperm.slane %v63_v45, 2 }
  0x12   :  { %72 = vmatpush.msra.mxu0 %v22_v14  ;;  %115 = vmatpush.msra.mxu2 %v59_v36 }
  0x13   :  { %96 = vmatpush.msra.mxu1 %v38_v19 }
  0x14   :  { %73 = vmatpush.msra.mxu0 %v21_v16  ;;  %116 = vmatpush.msra.mxu2 %v58_v37 }
  0x15   :  { %97 = vmatpush.msra.mxu1 %v37_v21 }
  0x16   :  { %74 = vmatpush.msra.mxu0 %v20_v18  ;;  %117 = vmatpush.msra.mxu2 %v57_v38 }
  0x17   :  { %98 = vmatpush.msra.mxu1 %v36_v23 }
  0x18   :  { %75 = vmatpush.msra.mxu0 %v19_v20  ;;  %118 = vmatpush.msra.mxu2 %v56_v39 }
  0x19   :  { %99 = vmatpush.msra.mxu1 %v35_v25 }
  0x1a   :  { %76 = vmatpush.msra.mxu0 %v18_v22  ;;  %119 = vmatpush.msra.mxu2 %v55_v40 }
  0x1b   :  { %100 = vmatpush.msra.mxu1 %v34_v29 }
  0x1c   :  { %77 = vmatpush.msra.mxu0 %v17_v24  ;;  %120 = vmatpush.msra.mxu2 %v54_v41 }
  0x1d   :  { %101 = vmatpush.msra.mxu1 %v33_v30 }
  0x1e   :  { %78 = vmatpush.msra.mxu0 %v16_v26  ;;  %121 = vmatpush.msra.mxu2 %v53_v42 }
  0x1f   :  { %102 = vmatpush.msra.mxu1 %v32_v31 }
  0x20   :  { %79 = vmatpush.msra.mxu0 %v15_v27  ;;  %122 = vmatpush.msra.mxu2 %v52_v43 }
  0x21   :  { %80 = vmatmul.f32.vlgmr.msra.gmra.mxu0 %v14_v28  ;;  %103 = vmatpush.msra.mxu1 %v31_v32 }
  0x22   :  { %123 = vmatpush.msra.mxu2 %v51_v44 }
  0x24   :  { %124 = vmatpush.msra.mxu2 %v50_v51 }
  0x26   :  { %125 = vmatpush.msra.mxu2 %v49_v52 }
  0x28   :  { %126 = vmatpush.msra.mxu2 %v48_v53 }
  0x2a   :  { %127 = vmatpush.msra.mxu2 %v47_v54 }
  0x9e   :  { %v81_v47 = vpop.f32.mrf.mxu0 }
  0x9f   :  { %v84_v48 = vmul.f32 %v81_v47, %v14_v28 }
  0xa1   :  { %v86_v49 = vadd.f32 %v85_v46, %v84_v48 }
  0xa3   :  { %v87_v50 = vadd.f32 %v86_v49, %v14_v28 }
  0xa5   :  { %104 = vmatmul.f32.vlgmr.msra.gmra.mxu1 %v87_v50 }
 0x122   :  { %v105_v56 = vpop.f32.mrf.mxu1 }
 0x123   :  { %v108_v57 = vmul.f32 %v105_v56, %v14_v28 }
 0x125   :  { %v110_v58 = vadd.f32 %v109_v55, %v108_v57 }
 0x127   :  { %v111_v59 = vadd.f32 %v110_v58, %v87_v50 }
 0x129   :  { %128 = vmatmul.f32.vlgmr.msra.gmra.mxu2 %v111_v59 }
 0x1ac   :  { %v129_v61 = vpop.f32.mrf.mxu2 }
 0x1ad   :  { %v132_v62 = vmul.f32 %v129_v61, %v14_v28 }
 0x1af   :  { %v134_v63 = vadd.f32 %v133_v60, %v132_v62 }
 0x1b1   :  { %v135_v0 = vadd.f32 %v134_v63, %v111_v59 }
 0x1b3   :  { %136 = vst [vmem:[%s317_s3] sm:$0xff] %v135_v0 }

</bundles_post_ra>
